<compile_context>
chip_gen: v5e
topology: v5e:2x2
jax: 0.10.0
libtpu: 0.0.40
codegen_flags: <defaults>
</compile_context>

<pallas_src>
import jax
import jax.numpy as jnp
from jax.experimental import pallas as pl
from jax.experimental.pallas import tpu as pltpu

LANE = 128               # MXU/vreg lane width: fc2 computed on a 128-lane slab
NEG_LARGE = -1e30        # bias for padded fc2 lanes -> exp() underflows to exactly 0
MEGACORE_MIN_ROWS = 256  # force >=2 batch tiles above this so v7x's 2 TCs both get work


def policy_net_kernel(x_ref, w1_ref, b1_ref, w2_ref, b2_ref, o_ref):
    x = x_ref[...]                   # (TB, In)  f32
    w1 = w1_ref[...]                 # (In, H)   f32
    # fc1 on the VPU: In (=6) broadcast-FMAs instead of a wasteful K=6 MXU matmul.
    h = x[:, 0:1] * w1[0:1, :] + b1_ref[...]
    for k in range(1, x.shape[1]):
        h = h + x[:, k:k + 1] * w1[k:k + 1, :]
    h = jnp.maximum(h, 0.0)          # (TB, H); kept f32 (v5e has no bf16 VALU)

    # fc2 on the MXU at native bf16 rate, f32 accumulate; w2 pre-padded to 128 lanes.
    logits = jnp.dot(h.astype(jnp.bfloat16), w2_ref[...],
                     preferred_element_type=jnp.float32)
    logits = logits + b2_ref[...]    # (TB, LANE); padded lanes carry -1e30

    # Numerically stable softmax; padded lanes contribute exp(-huge) == 0.
    m = jnp.max(logits, axis=1, keepdims=True)
    e = jnp.exp(logits - m)
    denom = jnp.sum(e, axis=1, keepdims=True)
    probs = e / denom                # exact divide -> rows sum to 1 (fixes prev failure)
    # Narrow store: only the real output lanes hit HBM (masked vst, ~42x fewer bytes).
    o_ref[...] = probs[:, :o_ref.shape[1]].astype(o_ref.dtype)


def _round_up(a, m):
    return (a + m - 1) // m * m


def prepare_params(w1, b1, w2, b2):
    """One-time parameter prep (hoisted out of the per-call path)."""
    H, Out = w2.shape
    w1_p = w1.astype(jnp.float32)                                  # (In, H)
    b1_p = jnp.reshape(b1, (1, H)).astype(jnp.float32)             # (1, H)
    w2_p = jnp.zeros((H, LANE), jnp.bfloat16).at[:, :Out].set(
        w2.astype(jnp.bfloat16))                                   # (H, 128) bf16
    b2_p = jnp.full((1, LANE), NEG_LARGE, jnp.float32).at[:, :Out].set(
        jnp.reshape(b2, (1, Out)).astype(jnp.float32))             # (1, 128)
    return (w1_p, b1_p, w2_p, b2_p, Out)


def policy_net_forward(x, params, *, tile_b=2048):
    w1, b1, w2_p, b2_p, Out = params
    B, In = x.shape
    H = w1.shape[1]

    # Batch tiling: waste < 8 rows; >=2 tiles for large B so v7x's 2 TCs share work.
    # Per-step VMEM (~1-2 MiB even at TB=2048) fits every generation with margin,
    # so do NOT shrink tiles / set vmem_limit_bytes for v7x — tiling here is
    # step-overhead limited, not VMEM limited.
    n_tiles = pl.cdiv(B, tile_b)
    if B >= MEGACORE_MIN_ROWS:
        n_tiles = max(n_tiles, 2)
    TB = _round_up(pl.cdiv(B, n_tiles), 8)
    B_pad = n_tiles * TB

    x_p = x if x.dtype == jnp.float32 else x.astype(jnp.float32)
    if B_pad != B:
        x_p = jnp.pad(x_p, ((0, B_pad - B), (0, 0)))

    cost = pl.CostEstimate(
        flops=2 * B_pad * H * (In + LANE),
        transcendentals=B_pad * LANE,
        bytes_accessed=(4 * (B_pad * In + In * H + H + LANE + B_pad * Out)
                        + 2 * H * LANE),
    )

    out = pl.pallas_call(
        policy_net_kernel,
        out_shape=jax.ShapeDtypeStruct((B_pad, Out), jnp.float32),
        grid=(n_tiles,),
        in_specs=[
            pl.BlockSpec((TB, In), lambda i: (i, 0)),    # x: tiled over batch
            pl.BlockSpec((In, H), lambda i: (0, 0)),     # w1 (f32): VMEM-resident
            pl.BlockSpec((1, H), lambda i: (0, 0)),      # b1: resident
            pl.BlockSpec((H, LANE), lambda i: (0, 0)),   # w2 (bf16, lane-padded): resident
            pl.BlockSpec((1, LANE), lambda i: (0, 0)),   # b2 (lane-padded, -1e30 fill): resident
        ],
        out_specs=pl.BlockSpec((TB, Out), lambda i: (i, 0)),  # narrow writeback
        compiler_params=pltpu.CompilerParams(
            dimension_semantics=("parallel",)),          # shard batch tiles across TCs (v7x)
        cost_estimate=cost,
    )(x_p, w1, b1, w2_p, b2_p)

    return out if B_pad == B else out[:B]


def init_params(key, input_size=6, hidden_size=128, output_size=3):
    # Mimic PyTorch nn.Linear default init: U(-1/sqrt(fan_in), 1/sqrt(fan_in))
    k1, k2, k3, k4 = jax.random.split(key, 4)
    bound1 = 1.0 / jnp.sqrt(float(input_size))
    bound2 = 1.0 / jnp.sqrt(float(hidden_size))
    w1 = jax.random.uniform(k1, (input_size, hidden_size), jnp.float32, -bound1, bound1)
    b1 = jax.random.uniform(k2, (hidden_size,), jnp.float32, -bound1, bound1)
    w2 = jax.random.uniform(k3, (hidden_size, output_size), jnp.float32, -bound2, bound2)
    b2 = jax.random.uniform(k4, (output_size,), jnp.float32, -bound2, bound2)
    return w1, b1, w2, b2


def reference(x, w1, b1, w2, b2):
    h = jnp.maximum(x @ w1 + b1[None, :], 0.0)
    return jax.nn.softmax(h @ w2 + b2[None, :], axis=1)


if __name__ == "__main__":
    key = jax.random.PRNGKey(0)
    kx, kp = jax.random.split(key)

    INPUT, HIDDEN, OUTPUT = 6, 128, 3
    w1, b1, w2, b2 = init_params(kp, INPUT, HIDDEN, OUTPUT)
    params = prepare_params(w1, b1, w2, b2)   # one-time: pad/cast weights

    # Canonical small shape (matches the PyTorch module's intended usage).
    B = 8
    x = jax.random.normal(kx, (B, INPUT), jnp.float32)
    out = jax.block_until_ready(policy_net_forward(x, params))
    ref = reference(x, w1, b1, w2, b2)
    assert out.shape == (B, OUTPUT)
    assert jnp.allclose(out, ref, atol=1e-2, rtol=1e-2)          # bf16 fc2 tolerance
    assert jnp.allclose(jnp.sum(out, axis=1), 1.0, atol=1e-5)    # exact divide

    # Second check: non-multiple-of-tile batch + multi-step grid
    # (exercises batch padding policy, resident weights, pipelining, megacore split).
    B2 = 260
    x2 = jax.random.normal(jax.random.PRNGKey(1), (B2, INPUT), jnp.float32)
    out2 = jax.block_until_ready(policy_net_forward(x2, params, tile_b=128))
    ref2 = reference(x2, w1, b1, w2, b2)
    assert out2.shape == (B2, OUTPUT)
    assert jnp.allclose(out2, ref2, atol=1e-2, rtol=1e-2)
    assert jnp.allclose(jnp.sum(out2, axis=1), 1.0, atol=1e-5)

    print("KERNEL_OK")
</pallas_src>

<mosaic_0001>
module attributes {stable_mosaic.version = 11 : i64} {
  func.func @policy_net_kernel(%arg0: i32, %arg1: memref<8x6xf32, #tpu.memory_space<vmem>>, %arg2: memref<6x128xf32, #tpu.memory_space<vmem>>, %arg3: memref<1x128xf32, #tpu.memory_space<vmem>>, %arg4: memref<128x128xbf16, #tpu.memory_space<vmem>>, %arg5: memref<1x128xf32, #tpu.memory_space<vmem>>, %arg6: memref<8x3xf32, #tpu.memory_space<vmem>>) attributes {dimension_semantics = [#tpu.dimension_semantics<parallel>], iteration_bounds = array<i64: 1>, scalar_prefetch = 0 : i64, scratch_operands = 0 : i64, tpu.core_type = #tpu.core_type<tc>, window_params = [{transform_indices = @transform_0, window_bounds = array<i64: 8, 6>}, {pipeline_mode = #tpu.pipeline_mode<synchronous>, transform_indices = @transform_1, window_bounds = array<i64: 6, 128>}, {pipeline_mode = #tpu.pipeline_mode<synchronous>, transform_indices = @transform_2, window_bounds = array<i64: 1, 128>}, {pipeline_mode = #tpu.pipeline_mode<synchronous>, transform_indices = @transform_3, window_bounds = array<i64: 128, 128>}, {pipeline_mode = #tpu.pipeline_mode<synchronous>, transform_indices = @transform_4, window_bounds = array<i64: 1, 128>}, {transform_indices = @transform_5, window_bounds = array<i64: 8, 3>}]} {
    %c0 = arith.constant 0 : index
    %c0_0 = arith.constant 0 : index
    %0 = vector.load %arg1[%c0, %c0_0] : memref<8x6xf32, #tpu.memory_space<vmem>>, vector<8x6xf32>
    %c0_1 = arith.constant 0 : index
    %c0_2 = arith.constant 0 : index
    %1 = vector.load %arg2[%c0_1, %c0_2] : memref<6x128xf32, #tpu.memory_space<vmem>>, vector<6x128xf32>
    %2 = vector.extract_strided_slice %0 {offsets = [0, 0], sizes = [8, 1], strides = [1, 1]} : vector<8x6xf32> to vector<8x1xf32>
    %3 = vector.extract_strided_slice %1 {offsets = [0, 0], sizes = [1, 128], strides = [1, 1]} : vector<6x128xf32> to vector<1x128xf32>
    %4 = vector.broadcast %2 : vector<8x1xf32> to vector<8x128xf32>
    %5 = vector.broadcast %3 : vector<1x128xf32> to vector<8x128xf32>
    %6 = arith.mulf %4, %5 : vector<8x128xf32>
    %c0_3 = arith.constant 0 : index
    %c0_4 = arith.constant 0 : index
    %7 = vector.load %arg3[%c0_3, %c0_4] : memref<1x128xf32, #tpu.memory_space<vmem>>, vector<1x128xf32>
    %8 = vector.broadcast %7 : vector<1x128xf32> to vector<8x128xf32>
    %9 = arith.addf %6, %8 : vector<8x128xf32>
    %10 = vector.extract_strided_slice %0 {offsets = [0, 1], sizes = [8, 1], strides = [1, 1]} : vector<8x6xf32> to vector<8x1xf32>
    %11 = vector.extract_strided_slice %1 {offsets = [1, 0], sizes = [1, 128], strides = [1, 1]} : vector<6x128xf32> to vector<1x128xf32>
    %12 = vector.broadcast %10 : vector<8x1xf32> to vector<8x128xf32>
    %13 = vector.broadcast %11 : vector<1x128xf32> to vector<8x128xf32>
    %14 = arith.mulf %12, %13 : vector<8x128xf32>
    %15 = arith.addf %9, %14 : vector<8x128xf32>
    %16 = vector.extract_strided_slice %0 {offsets = [0, 2], sizes = [8, 1], strides = [1, 1]} : vector<8x6xf32> to vector<8x1xf32>
    %17 = vector.extract_strided_slice %1 {offsets = [2, 0], sizes = [1, 128], strides = [1, 1]} : vector<6x128xf32> to vector<1x128xf32>
    %18 = vector.broadcast %16 : vector<8x1xf32> to vector<8x128xf32>
    %19 = vector.broadcast %17 : vector<1x128xf32> to vector<8x128xf32>
    %20 = arith.mulf %18, %19 : vector<8x128xf32>
    %21 = arith.addf %15, %20 : vector<8x128xf32>
    %22 = vector.extract_strided_slice %0 {offsets = [0, 3], sizes = [8, 1], strides = [1, 1]} : vector<8x6xf32> to vector<8x1xf32>
    %23 = vector.extract_strided_slice %1 {offsets = [3, 0], sizes = [1, 128], strides = [1, 1]} : vector<6x128xf32> to vector<1x128xf32>
    %24 = vector.broadcast %22 : vector<8x1xf32> to vector<8x128xf32>
    %25 = vector.broadcast %23 : vector<1x128xf32> to vector<8x128xf32>
    %26 = arith.mulf %24, %25 : vector<8x128xf32>
    %27 = arith.addf %21, %26 : vector<8x128xf32>
    %28 = vector.extract_strided_slice %0 {offsets = [0, 4], sizes = [8, 1], strides = [1, 1]} : vector<8x6xf32> to vector<8x1xf32>
    %29 = vector.extract_strided_slice %1 {offsets = [4, 0], sizes = [1, 128], strides = [1, 1]} : vector<6x128xf32> to vector<1x128xf32>
    %30 = vector.broadcast %28 : vector<8x1xf32> to vector<8x128xf32>
    %31 = vector.broadcast %29 : vector<1x128xf32> to vector<8x128xf32>
    %32 = arith.mulf %30, %31 : vector<8x128xf32>
    %33 = arith.addf %27, %32 : vector<8x128xf32>
    %34 = vector.extract_strided_slice %0 {offsets = [0, 5], sizes = [8, 1], strides = [1, 1]} : vector<8x6xf32> to vector<8x1xf32>
    %35 = vector.extract_strided_slice %1 {offsets = [5, 0], sizes = [1, 128], strides = [1, 1]} : vector<6x128xf32> to vector<1x128xf32>
    %36 = vector.broadcast %34 : vector<8x1xf32> to vector<8x128xf32>
    %37 = vector.broadcast %35 : vector<1x128xf32> to vector<8x128xf32>
    %38 = arith.mulf %36, %37 : vector<8x128xf32>
    %39 = arith.addf %33, %38 : vector<8x128xf32>
    %cst = arith.constant 0.000000e+00 : f32
    %40 = vector.broadcast %cst : f32 to vector<8x128xf32>
    %41 = arith.maximumf %39, %40 : vector<8x128xf32>
    %42 = arith.truncf %41 : vector<8x128xf32> to vector<8x128xbf16>
    %c0_5 = arith.constant 0 : index
    %c0_6 = arith.constant 0 : index
    %43 = vector.load %arg4[%c0_5, %c0_6] : memref<128x128xbf16, #tpu.memory_space<vmem>>, vector<128x128xbf16>
    %cst_7 = arith.constant dense<0.000000e+00> : vector<8x128xf32>
    %44 = tpu.matmul %42, %43, %cst_7 {dimension_numbers = #tpu.dot_dimension_numbers<[1], [0], [0], [1], [0, 0, 1, 1], [], []>} : vector<8x128xbf16>, vector<128x128xbf16>, vector<8x128xf32> -> vector<8x128xf32>
    %c0_8 = arith.constant 0 : index
    %c0_9 = arith.constant 0 : index
    %45 = vector.load %arg5[%c0_8, %c0_9] : memref<1x128xf32, #tpu.memory_space<vmem>>, vector<1x128xf32>
    %46 = vector.broadcast %45 : vector<1x128xf32> to vector<8x128xf32>
    %47 = arith.addf %44, %46 : vector<8x128xf32>
    %cst_10 = arith.constant dense<0xFF800000> : vector<8xf32>
    %48 = vector.multi_reduction <maximumf>, %47, %cst_10 [1] : vector<8x128xf32> to vector<8xf32>
    %49 = vector.shape_cast %48 : vector<8xf32> to vector<8x1xf32>
    %50 = vector.broadcast %49 : vector<8x1xf32> to vector<8x128xf32>
    %51 = arith.subf %47, %50 : vector<8x128xf32>
    %52 = math.exp %51 : vector<8x128xf32>
    %cst_11 = arith.constant dense<0.000000e+00> : vector<8xf32>
    %53 = vector.multi_reduction <add>, %52, %cst_11 [1] : vector<8x128xf32> to vector<8xf32>
    %54 = vector.shape_cast %53 : vector<8xf32> to vector<8x1xf32>
    %55 = vector.broadcast %54 : vector<8x1xf32> to vector<8x128xf32>
    %56 = arith.divf %52, %55 : vector<8x128xf32>
    %57 = vector.extract_strided_slice %56 {offsets = [0, 0], sizes = [8, 3], strides = [1, 1]} : vector<8x128xf32> to vector<8x3xf32>
    %c0_12 = arith.constant 0 : index
    %c0_13 = arith.constant 0 : index
    %58 = vector.load %arg6[%c0_12, %c0_13] : memref<8x3xf32, #tpu.memory_space<vmem>>, vector<8x3xf32>
    tpu.vector_store %arg6[%c0_12, %c0_13], %57 {strides = array<i32>} : memref<8x3xf32, #tpu.memory_space<vmem>>, vector<8x3xf32>,
    return
  }
  func.func @transform_0(%arg0: i32) -> (i32, i32) {
    %c0_i32 = arith.constant 0 : i32
    %c0_i32_0 = arith.constant 0 : i32
    return %arg0, %c0_i32 : i32, i32
  }
  func.func @transform_1(%arg0: i32) -> (i32, i32) {
    %c0_i32 = arith.constant 0 : i32
    %c0_i32_0 = arith.constant 0 : i32
    %c0_i32_1 = arith.constant 0 : i32
    return %c0_i32, %c0_i32_0 : i32, i32
  }
  func.func @transform_2(%arg0: i32) -> (i32, i32) {
    %c0_i32 = arith.constant 0 : i32
    %c0_i32_0 = arith.constant 0 : i32
    %c0_i32_1 = arith.constant 0 : i32
    return %c0_i32, %c0_i32_0 : i32, i32
  }
  func.func @transform_3(%arg0: i32) -> (i32, i32) {
    %c0_i32 = arith.constant 0 : i32
    %c0_i32_0 = arith.constant 0 : i32
    %c0_i32_1 = arith.constant 0 : i32
    return %c0_i32, %c0_i32_0 : i32, i32
  }
  func.func @transform_4(%arg0: i32) -> (i32, i32) {
    %c0_i32 = arith.constant 0 : i32
    %c0_i32_0 = arith.constant 0 : i32
    %c0_i32_1 = arith.constant 0 : i32
    return %c0_i32, %c0_i32_0 : i32, i32
  }
  func.func @transform_5(%arg0: i32) -> (i32, i32) {
    %c0_i32 = arith.constant 0 : i32
    %c0_i32_0 = arith.constant 0 : i32
    return %arg0, %c0_i32 : i32, i32
  }
}

</mosaic_0001>

<bundles_post_ra>
// kernel: tpu_custom_call.1
= control target key start
LH: loop header
LB: loop body
LE: loop exit
PB: predicated region body
PF: predicated region fallthrough
CT: control target
= control target key end

     0   :  { %10 = vsyncpa [#allocation3], 0  ;;  %s424_s0 = inlined_call_operand.hbm [shape: f32[8,6], index: 0, kind: input, shape index: {}]   ;;  %s425_s1 = inlined_call_operand.hbm [shape: f32[6,128], index: 1, kind: input, shape index: {}]   ;;  %s426_s2 = inlined_call_operand.vmem [shape: f32[1,128], index: 2, kind: input, shape index: {}]   ;;  %s427_s3 = inlined_call_operand.hbm [shape: bf16[128,128], index: 3, kind: input, shape index: {}]   ;;  %s428_s4 = inlined_call_operand.vmem [shape: f32[1,128], index: 4, kind: input, shape index: {}]   ;;  %s429_s5 = inlined_call_operand.vmem [shape: f32[8,3], index: 5, kind: output, shape index: {}]  }
   0x1   :  { %11 = vsyncpa [#allocation5], 0  ;;  %s28_s20 = sshll.u32 %s425_s1, 4  ;;  %s365_s21 = smov [#allocation4]   ;;  %s29_s20 = int_to_ptr.hbm [resolvable:$true] %s28_s20 }
   0x2   :  { %s30_s22 = sshll.u32 %s365_s21, 4  ;;  %s17_s25 = sshll.u32 %s424_s0, 4  ;;  %s31_s22 = int_to_ptr.vmem [resolvable:$true] %s30_s22  ;;  %s18_s25 = int_to_ptr.hbm [resolvable:$true] %s17_s25 }
   0x3   :  { %33 = dma.hbm_to_vmem [thread:$0]  %s29_s20, 128, %s31_s22, [#allocation5]  }
   0x4   :  { %s366_s26 = smov [#allocation2]   ;;  %s40_s30 = sshll.u32 %s427_s3, 4  ;;  %s41_s30 = int_to_ptr.hbm [resolvable:$true] %s40_s30 }
   0x5   :  { %s19_s27 = sshll.u32 %s366_s26, 4  ;;  %s367_s1 = smov [#allocation6]   ;;  %s20_s27 = int_to_ptr.vmem [resolvable:$true] %s19_s27 }
   0x6   :  { %22 = dma.hbm_to_vmem [thread:$0]  %s18_s25, 128, %s20_s27, [#allocation3]  }
   0x7   :  { %s42_s6 = sshll.u32 %s367_s1, 4  ;;  %s368_s7 = smov 64   ;;  %s43_s6 = int_to_ptr.vmem [resolvable:$true] %s42_s6 }
   0x8   :  { %s369_s8 = smov 4  }
   0x9   :  { %48 = dma.hbm_to_vmem [thread:$0]  %s41_s30, 1024, %s43_s6, [#allocation5], %s368_s7, %s368_s7, %s369_s8  }
   0xa   :  { %361 = dma.done.wait [#allocation3], 128  }
   0xb   :  { %362 = vsyncadd [#allocation3], 4294967168 }
   0xc   :  { %363 = dma.done.wait [#allocation5], 1152  }
   0xd   :  { %364 = vsyncadd [#allocation5], 4294966144  ;;  %v370_v0 = vmov 0   ;;  %v371_v1 = vmov 2   ;;  %v372_v2 = vmov 4   ;;  %v63_v3 = vld [vmem:[#allocation2] sm:$0xff] }
   0xe   :  { %276 = vset.pattern.permute.xlu0 %v370_v0  ;;  %278 = vset.pattern.permute.xlu1 %v371_v1  ;;  %v264_v4 = vld [vmem:[#allocation6 + $0x38] sm:$0xff]  ;;  %v263_v5 = vld [vmem:[#allocation6 + $0x30] sm:$0xff]  ;;  %v373_v6 = vmov 1   ;;  %v374_v7 = vmov 3   ;;  %v375_v8 = vmov 5   ;;  %v262_v9 = vld [vmem:[#allocation6 + $0x28] sm:$0xff] }
   0xf   :  { %280 = vset.pattern.permute.xlu2 %v372_v2  ;;  %67 = vperm.xlu0 %276, %v63_v3   ;;  %v261_v10 = vld [vmem:[#allocation6 + $0x20] sm:$0xff]  ;;  %v260_v11 = vld [vmem:[#allocation6 + $0x18] sm:$0xff]  ;;  %v259_v12 = vld [vmem:[#allocation6 + $0x10] sm:$0xff]  ;;  %vm217_vm4 = vcmask 23552  }
  0x10   :  { %85 = vperm.xlu1 %278, %v63_v3   ;;  %99 = vperm.xlu2 %280, %v63_v3   ;;  %v258_v13 = vld [vmem:[#allocation6 + $0x8] sm:$0xff]  ;;  %v257_v14 = vld [vmem:[#allocation6] sm:$0xff]  ;;  %v64_v15 = vld [vmem:[#allocation4] sm:$0x3f] }
  0x11   :  { %182 = vmatpush.bf16.msra.mxu0 %v264_v4  ;;  %v70_v18 = vperm.slane %v64_v15, 0  ;;  %v283_v20 = vld [vmem:[%s426_s2] ss:$0 sm:$0xff]  ;;  %v81_v22 = vperm.slane %v64_v15, 1  ;;  %v88_v23 = vperm.slane %v64_v15, 2  ;;  %v95_v24 = vperm.slane %v64_v15, 3 }
  0x12   :  { %v102_v29 = vperm.slane %v64_v15, 4  ;;  %v109_v33 = vperm.slane %v64_v15, 5  ;;  %v284_v43 = vld [vmem:[%s428_s4] ss:$0 sm:$0xff] }
  0x15   :  { %183 = vmatpush.bf16.msra.mxu0 %v263_v5 }
  0x17   :  { %277 = vset.pattern.permute.xlu0 %v373_v6 }
  0x18   :  { %279 = vset.pattern.permute.xlu1 %v374_v7  ;;  %78 = vperm.xlu0 %277, %v63_v3  }
  0x19   :  { %92 = vperm.xlu1 %279, %v63_v3   ;;  %281 = vset.pattern.permute.xlu2 %v375_v8 }
  0x1a   :  { %106 = vperm.xlu2 %281, %v63_v3   ;;  %184 = vmatpush.bf16.msra.mxu0 %v262_v9 }
  0x1e   :  { %185 = vmatpush.bf16.msra.mxu0 %v261_v10 }
  0x20   :  { %282 = vset.pattern.permute.xlu0 %v375_v8 }
  0x22   :  { %186 = vmatpush.bf16.msra.mxu0 %v260_v11 }
  0x26   :  { %187 = vmatpush.bf16.msra.mxu0 %v259_v12 }
  0x2a   :  { %188 = vmatpush.bf16.msra.mxu0 %v258_v13 }
  0x2e   :  { %189 = vmatpush.bf16.msra.mxu0 %v257_v14 }
  0x6a   :  { %v100_v19 = vpop.permute.xlu2 %99 }
  0x6b   :  { %v103_v36 = vmul.f32 %v102_v29, %v100_v19 }
  0x74   :  { %v107_v34 = vpop.permute.xlu2 %106 }
  0x75   :  { %v110_v38 = vmul.f32 %v109_v33, %v107_v34 }
  0x81   :  { %v68_v16 = vpop.permute.xlu0 %67 }
  0x82   :  { %v86_v17 = vpop.permute.xlu1 %85  ;;  %v71_v21 = vmul.f32 %v70_v18, %v68_v16 }
  0x83   :  { %v89_v30 = vmul.f32 %v88_v23, %v86_v17 }
  0x84   :  { %v76_v27 = vadd.f32 %v283_v20, %v71_v21 }
  0x8a   :  { %v79_v25 = vpop.permute.xlu0 %78 }
  0x8b   :  { %v93_v26 = vpop.permute.xlu1 %92  ;;  %v82_v28 = vmul.f32 %v81_v22, %v79_v25 }
  0x8c   :  { %v96_v32 = vmul.f32 %v95_v24, %v93_v26 }
  0x8d   :  { %v83_v31 = vadd.f32 %v82_v28, %v76_v27 }
  0x8f   :  { %v90_v35 = vadd.f32 %v89_v30, %v83_v31 }
  0x91   :  { %v97_v37 = vadd.f32 %v96_v32, %v90_v35 }
  0x93   :  { %v104_v39 = vadd.f32 %v103_v36, %v97_v37 }
  0x95   :  { %v111_v40 = vadd.f32 %v110_v38, %v104_v39 }
  0x97   :  { %v112_v41 = vmax.f32 %v111_v40, 0.0 }
  0x99   :  { %v113_v42 = vpack.c.bf16 %v112_v41, %v112_v41 }
  0x9b   :  { %190 = vmatmul.bf16.vlgmr.msra.gmra.mxu0 %v113_v42 }
 0x118   :  { %v191_v44 = vpop.f32.mrf.mxu0 }
 0x119   :  { %v192_v45 = vadd.f32 %v284_v43, %v191_v44 }
 0x11b   :  { %195 = vmax.xlane.f32.xlu1 %v192_v45 }
 0x120   :  { %v193_v46 = vpop.f32.mrf.mxu0 }
 0x18e   :  { %v196_v47 = vpop.xlane.xlu1 %195 }
 0x18f   :  { %v197_v48 = vsub.f32 %v192_v45, %v196_v47 }
 0x191   :  { %v198_v49 = vmul.f32 1.442695, %v197_v48 }
 0x193   :  { %285 = vpow2.f32 %v198_v49 }
 0x199   :  { %v286_v50 = vpop.eup %285 }
 0x19a   :  { %200 = vadd.xlane.f32.xlu2 %v286_v50 }
 0x20d   :  { %v201_v51 = vpop.xlane.xlu2 %200 }
 0x20e   :  { %287 = vrcp.f32 %v201_v51  ;;  %v213_v55 = vand.u32 2147483648, %v201_v51  ;;  %v211_v57 = vand.u32 2147483647, %v201_v51  ;;  %vm207_vm1 = vweird.f32 %v201_v51 }
 0x210   :  { %v214_v59 = vor.u32 1.1754944e-38, %v213_v55  ;;  %vm212_vm3 = vcmp.eq.f32.partialorder %v211_v57, 8.507059e+37 }
 0x214   :  { %v288_v52 = vpop.eup %287 }
 0x215   :  { %v203_v53 = vmul.f32 %v288_v52, %v201_v51  ;;  %vm208_vm0 = vweird.f32 %v288_v52 }
 0x216   :  { %vm209_vm2 = vmor %vm207_vm1, %vm208_vm0 }
 0x217   :  { %v204_v54 = vsub.f32 1.0, %v203_v53 }
 0x219   :  { %v205_v56 = vmul.f32 %v288_v52, %v204_v54 }
 0x21b   :  { %v206_v58 = vadd.f32 %v288_v52, %v205_v56 }
 0x21d   :  { %v210_v60 = vsel %vm209_vm2, %v288_v52, %v206_v58 }
 0x21e   :  { %v215_v61 = vsel %vm212_vm3, %v214_v59, %v210_v60 }
 0x21f   :  { %v216_v62 = vmul.f32 %v286_v50, %v215_v61 }
 0x221   :  { %218 = vst.msk [vmem:[%s429_s5] sm:$0xff] %vm217_vm4, %v216_v62 }
 0x222   :  { %223 = vsyncpa [#allocation3], 1 }
 0x223   :  { %224 = vsyncpa [#allocation5], 1 }

</bundles_post_ra>
